<compile_context>
chip_gen: v7x
topology: tpu7x:2x2x1
jax: 0.10.0
libtpu: 0.0.40
codegen_flags: <defaults>
</compile_context>

<pallas_src>
import jax
import jax.numpy as jnp
from jax.experimental import pallas as pl
from jax.experimental.pallas import tpu as pltpu

# Module constants (spatial size reduced for a small, fast example run)
EMBED_DIM = 128
IN_CH = 3
PATCH_SIZE = 16
IMG_SIZE = 64                                      # small stand-in for 256
N_PATCHES = (IMG_SIZE // PATCH_SIZE) ** 2          # 16
K_DIM = IN_CH * PATCH_SIZE * PATCH_SIZE            # 768


def _patch_embed_kernel(p_ref, w_ref, bias_ref, o_ref):
    """One grid step = `bb` whole images.

    p_ref    : (bb, Np, K)     bf16  flattened patch rows (streamed)
    w_ref    : (K, D)          bf16  conv weight as matmul operand (resident)
    bias_ref : (Np + 1, D)     f32   row 0: cls_token + pos[0]
                                     rows 1..Np: conv_bias + pos[1:] (resident)
    o_ref    : (bb, Np + 1, D) f32   final token embeddings for bb images
    """
    bb, n_p, k = p_ref.shape
    d = w_ref.shape[1]

    # One big MXU matmul over all bb*Np rows (Np is a multiple of 8, so the
    # leading-dim merge is layout-free).
    p = p_ref[...].reshape(bb * n_p, k)
    acc = jnp.dot(p, w_ref[...], preferred_element_type=jnp.float32)
    acc = acc.reshape(bb, n_p, d)

    # Projected patch tokens -> rows 1..Np (sublane-shifted store inside the
    # VMEM block; the HBM block is the full (Np+1, D) slab so no HBM-alignment
    # penalty).
    body_bias = bias_ref[pl.ds(1, n_p), :]                       # (Np, D)
    o_ref[:, pl.ds(1, n_p), :] = (acc + body_bias[None]).astype(o_ref.dtype)

    # cls token row (identical for every image) -> row 0.
    cls_row = bias_ref[pl.ds(0, 1), :]                           # (1, D)
    o_ref[:, pl.ds(0, 1), :] = jnp.broadcast_to(
        cls_row[None], (bb, 1, d)).astype(o_ref.dtype)


def _pick_bb(batch, n_patches, target_rows=1024):
    """Images per grid step: ~target_rows patch rows, divisor of B, >=2 steps."""
    cap = max(1, target_rows // n_patches)
    if batch >= 2:
        cap = min(cap, batch // 2)     # keep >=2 grid steps for v7x megacore
    cap = max(cap, 1)
    best = 1
    for bb in range(1, cap + 1):
        if batch % bb == 0:
            best = bb
    return best


def patch_embedding(x, conv_w, conv_b, cls_token, pos_embed):
    """x: (B, C, H, W) float32 -> (B, n_patches + 1, EMBED_DIM) float32."""
    B, C, H, W = x.shape
    P = PATCH_SIZE
    Hp, Wp = H // P, W // P
    Np = Hp * Wp
    D = EMBED_DIM
    K = C * P * P

    # Patchify in bf16, ordered (c, ph, pw) to match the Conv2d weight layout.
    # With allow_input_fusion XLA may fold this straight into the input DMA.
    patches = (x.astype(jnp.bfloat16)
                 .reshape(B, C, Hp, P, Wp, P)
                 .transpose(0, 2, 4, 1, 3, 5)
                 .reshape(B, Np, K))

    # conv weight (D, C, P, P) -> (K, D), bf16 (resident MXU operand).
    w_mat = conv_w.reshape(D, K).T.astype(jnp.bfloat16)

    # Fused bias / pos table: row 0 = cls + pos[0]; rows 1..Np = conv_b + pos[1:].
    bias = jnp.concatenate(
        [cls_token[0] + pos_embed[0, :1, :],
         conv_b[None, :] + pos_embed[0, 1:, :]],
        axis=0)                                                   # (Np+1, D) f32

    bb = _pick_bb(B, Np)
    n_steps = B // bb

    return pl.pallas_call(
        _patch_embed_kernel,
        out_shape=jax.ShapeDtypeStruct((B, Np + 1, D), jnp.float32),
        grid_spec=pltpu.PrefetchScalarGridSpec(
            num_scalar_prefetch=0,
            grid=(n_steps,),
            in_specs=[
                pl.BlockSpec((bb, Np, K), lambda i: (i, 0, 0)),    # streamed patches
                pl.BlockSpec((K, D), lambda i: (0, 0)),            # resident weight
                pl.BlockSpec((Np + 1, D), lambda i: (0, 0)),       # resident bias/pos
            ],
            out_specs=pl.BlockSpec((bb, Np + 1, D), lambda i: (i, 0, 0)),
        ),
        compiler_params=pltpu.CompilerParams(
            dimension_semantics=("parallel",),
            allow_input_fusion=[True, False, False],
            vmem_limit_bytes=32 * 1024 * 1024,   # covers v5e's 16 MiB default
        ),
    )(patches, w_mat, bias)


if __name__ == "__main__":
    key = jax.random.PRNGKey(0)
    k_x, k_w, k_b, k_cls, k_pos = jax.random.split(key, 5)

    B = 2
    x = jax.random.normal(k_x, (B, IN_CH, IMG_SIZE, IMG_SIZE), dtype=jnp.float32)

    conv_w = jax.random.normal(k_w, (EMBED_DIM, IN_CH, PATCH_SIZE, PATCH_SIZE),
                               dtype=jnp.float32) * 0.02
    conv_b = jax.random.normal(k_b, (EMBED_DIM,), dtype=jnp.float32) * 0.02
    cls_token = jax.random.normal(k_cls, (1, 1, EMBED_DIM), dtype=jnp.float32)
    pos_embed = jax.random.normal(k_pos, (1, N_PATCHES + 1, EMBED_DIM),
                                  dtype=jnp.float32)

    fn = jax.jit(patch_embedding)
    out = jax.block_until_ready(fn(x, conv_w, conv_b, cls_token, pos_embed))

    # Pure-JAX reference at matching (bf16-input, f32-accumulate) precision.
    P = PATCH_SIZE
    Hp = Wp = IMG_SIZE // P
    patches_ref = (x.reshape(B, IN_CH, Hp, P, Wp, P)
                     .transpose(0, 2, 4, 1, 3, 5)
                     .reshape(B, N_PATCHES, IN_CH * P * P))
    emb_ref = jnp.dot(patches_ref.astype(jnp.bfloat16),
                      conv_w.reshape(EMBED_DIM, -1).T.astype(jnp.bfloat16),
                      preferred_element_type=jnp.float32) + conv_b
    cls_ref = jnp.broadcast_to(cls_token, (B, 1, EMBED_DIM))
    ref = jnp.concatenate([cls_ref, emb_ref], axis=1) + pos_embed

    assert out.shape == (B, N_PATCHES + 1, EMBED_DIM)
    assert jnp.allclose(out, ref, atol=2e-2, rtol=2e-2), "mismatch vs reference"
    print("KERNEL_OK")
</pallas_src>

<mosaic_0001>
module attributes {stable_mosaic.version = 11 : i64} {
  func.func @_patch_embed_kernel(%arg0: i32, %arg1: memref<1x16x768xbf16, #tpu.memory_space<vmem>>, %arg2: memref<768x128xbf16, #tpu.memory_space<vmem>>, %arg3: memref<17x128xf32, #tpu.memory_space<vmem>>, %arg4: memref<1x17x128xf32, #tpu.memory_space<vmem>>) attributes {dimension_semantics = [#tpu.dimension_semantics<parallel>], iteration_bounds = array<i64: 2>, scalar_prefetch = 0 : i64, scratch_operands = 0 : i64, tpu.core_type = #tpu.core_type<tc>, window_params = [{transform_indices = @transform_0, window_bounds = array<i64: 1, 16, 768>}, {pipeline_mode = #tpu.pipeline_mode<synchronous>, transform_indices = @transform_1, window_bounds = array<i64: 768, 128>}, {pipeline_mode = #tpu.pipeline_mode<synchronous>, transform_indices = @transform_2, window_bounds = array<i64: 17, 128>}, {transform_indices = @transform_3, window_bounds = array<i64: 1, 17, 128>}]} {
    %c0 = arith.constant 0 : index
    %c0_0 = arith.constant 0 : index
    %c0_1 = arith.constant 0 : index
    %0 = vector.load %arg1[%c0, %c0_0, %c0_1] : memref<1x16x768xbf16, #tpu.memory_space<vmem>>, vector<1x16x768xbf16>
    %1 = vector.shape_cast %0 : vector<1x16x768xbf16> to vector<16x768xbf16>
    %c0_2 = arith.constant 0 : index
    %c0_3 = arith.constant 0 : index
    %2 = vector.load %arg2[%c0_2, %c0_3] : memref<768x128xbf16, #tpu.memory_space<vmem>>, vector<768x128xbf16>
    %cst = arith.constant dense<0.000000e+00> : vector<16x128xf32>
    %3 = tpu.matmul %1, %2, %cst {dimension_numbers = #tpu.dot_dimension_numbers<[1], [0], [0], [1], [0, 0, 1, 1], [], []>} : vector<16x768xbf16>, vector<768x128xbf16>, vector<16x128xf32> -> vector<16x128xf32>
    %4 = vector.shape_cast %3 : vector<16x128xf32> to vector<1x16x128xf32>
    %c1 = arith.constant 1 : index
    %c0_4 = arith.constant 0 : index
    %5 = vector.load %arg3[%c1, %c0_4] : memref<17x128xf32, #tpu.memory_space<vmem>>, vector<16x128xf32>
    %6 = vector.shape_cast %5 : vector<16x128xf32> to vector<1x16x128xf32>
    %7 = arith.addf %4, %6 : vector<1x16x128xf32>
    %c0_5 = arith.constant 0 : index
    %c1_6 = arith.constant 1 : index
    %c0_7 = arith.constant 0 : index
    %8 = vector.load %arg4[%c0_5, %c1_6, %c0_7] : memref<1x17x128xf32, #tpu.memory_space<vmem>>, vector<1x16x128xf32>
    tpu.vector_store %arg4[%c0_5, %c1_6, %c0_7], %7 {strides = array<i32>} : memref<1x17x128xf32, #tpu.memory_space<vmem>>, vector<1x16x128xf32>,
    %c0_8 = arith.constant 0 : index
    %c0_9 = arith.constant 0 : index
    %9 = vector.load %arg3[%c0_8, %c0_9] : memref<17x128xf32, #tpu.memory_space<vmem>>, vector<1x128xf32>
    %10 = vector.shape_cast %9 : vector<1x128xf32> to vector<1x1x128xf32>
    %c0_10 = arith.constant 0 : index
    %c0_11 = arith.constant 0 : index
    %c0_12 = arith.constant 0 : index
    %11 = vector.load %arg4[%c0_10, %c0_11, %c0_12] : memref<1x17x128xf32, #tpu.memory_space<vmem>>, vector<1x1x128xf32>
    tpu.vector_store %arg4[%c0_10, %c0_11, %c0_12], %10 {strides = array<i32>} : memref<1x17x128xf32, #tpu.memory_space<vmem>>, vector<1x1x128xf32>,
    return
  }
  func.func @transform_0(%arg0: i32) -> (i32, i32, i32) {
    %c0_i32 = arith.constant 0 : i32
    %c0_i32_0 = arith.constant 0 : i32
    %c0_i32_1 = arith.constant 0 : i32
    return %arg0, %c0_i32, %c0_i32_0 : i32, i32, i32
  }
  func.func @transform_1(%arg0: i32) -> (i32, i32) {
    %c0_i32 = arith.constant 0 : i32
    %c0_i32_0 = arith.constant 0 : i32
    %c0_i32_1 = arith.constant 0 : i32
    return %c0_i32, %c0_i32_0 : i32, i32
  }
  func.func @transform_2(%arg0: i32) -> (i32, i32) {
    %c0_i32 = arith.constant 0 : i32
    %c0_i32_0 = arith.constant 0 : i32
    %c0_i32_1 = arith.constant 0 : i32
    return %c0_i32, %c0_i32_0 : i32, i32
  }
  func.func @transform_3(%arg0: i32) -> (i32, i32, i32) {
    %c0_i32 = arith.constant 0 : i32
    %c0_i32_0 = arith.constant 0 : i32
    %c0_i32_1 = arith.constant 0 : i32
    return %arg0, %c0_i32, %c0_i32_0 : i32, i32, i32
  }
}

</mosaic_0001>

<bundles_post_ra>
// kernel: patch_embedding.1
= control target key start
LH: loop header
LB: loop body
LE: loop exit
PB: predicated region body
PF: predicated region fallthrough
CT: control target
= control target key end

     0   :  { %s1002_s12 = smov 0   ;;  %s1188_s0 = inlined_call_operand.vmem [shape: bf16[2,16,768], index: 0, kind: input, shape index: {}]   ;;  %s1189_s1 = inlined_call_operand.vmem [shape: bf16[768,128], index: 1, kind: input, shape index: {}]   ;;  %s1190_s2 = inlined_call_operand.vmem [shape: f32[17,128], index: 2, kind: input, shape index: {}]   ;;  %s1191_s3 = inlined_call_operand.vmem [shape: f32[2,17,128], index: 3, kind: output, shape index: {}]  }
   0x1 LB: > { %s778_s13 = sadd.s32 4294967295, %s980_s12   ;;  %p782_p0 = scmp.ge.s32.totalorder %s980_s12, 1  ;;  %s980_s12 = sphi %s1002_s12, %s13_s12  }
   0x2   : > { %p137_p1 = scmp.lt.s32.totalorder %s980_s12, 3 }
   0x4   : > { %p138_p2 = pnand %p782_p0, %p137_p1 }
   0x5   : > { %v917_v0 = vld [vmem:[%s1189_s1 + $0x40] sm:$0xff] (!%p138_p2)   ;;  %v921_v4 = vld [vmem:[%s1189_s1 + $0x48] sm:$0xff] (!%p138_p2)   ;;  %v925_v8 = vld [vmem:[%s1189_s1 + $0x50] sm:$0xff] (!%p138_p2)   ;;  %p161_p3 = scmp.lt.s32.totalorder (!%p138_p2), %s778_s13, 1 }
   0x6   : > { %141 = sbr.rel (%p138_p2) target bundleno = 293 (0x125), region = 32  ;;  %v918_v1 = vld [vmem:[%s1189_s1 + $0xc0] sm:$0xff] (!%p138_p2)   ;;  %841 = vmatprep.subr.bf16.mxu0 (!%p138_p2), %v917_v0  ;;  %v922_v5 = vld [vmem:[%s1189_s1 + $0xc8] sm:$0xff] (!%p138_p2)   ;;  %v926_v9 = vld [vmem:[%s1189_s1 + $0xd0] sm:$0xff] (!%p138_p2)  }
   0x7   : > { %v919_v2 = vld [vmem:[%s1189_s1] sm:$0xff] (!%p138_p2)   ;;  %863 = vmatprep.subr.bf16.mxu1 (!%p138_p2), %v918_v1  ;;  %v923_v6 = vld [vmem:[%s1189_s1 + $0x8] sm:$0xff] (!%p138_p2)   ;;  %v927_v10 = vld [vmem:[%s1189_s1 + $0x10] sm:$0xff] (!%p138_p2)  }
   0x8   : > { %v920_v3 = vld [vmem:[%s1189_s1 + $0x80] sm:$0xff] (!%p138_p2)   ;;  %842 = vmatpush3.bf16.msra.mxu0 (!%p138_p2), %v919_v2  ;;  %v924_v7 = vld [vmem:[%s1189_s1 + $0x88] sm:$0xff] (!%p138_p2)   ;;  %v928_v11 = vld [vmem:[%s1189_s1 + $0x90] sm:$0xff] (!%p138_p2)  }
   0x9   : > { %864 = vmatpush3.bf16.msra.mxu1 (!%p138_p2), %v920_v3  ;;  %843 = vmatprep.subr.bf16.mxu0 (!%p138_p2), %v921_v4  ;;  %v929_v12 = vld [vmem:[%s1189_s1 + $0x58] sm:$0xff] (!%p138_p2)   ;;  %v933_v16 = vld [vmem:[%s1189_s1 + $0x60] sm:$0xff] (!%p138_p2)   ;;  %v937_v20 = vld [vmem:[%s1189_s1 + $0x68] sm:$0xff] (!%p138_p2)  }
   0xa   : > { %865 = vmatprep.subr.bf16.mxu1 (!%p138_p2), %v922_v5  ;;  %v930_v13 = vld [vmem:[%s1189_s1 + $0xd8] sm:$0xff] (!%p138_p2)   ;;  %v934_v17 = vld [vmem:[%s1189_s1 + $0xe0] sm:$0xff] (!%p138_p2)   ;;  %v938_v21 = vld [vmem:[%s1189_s1 + $0xe8] sm:$0xff] (!%p138_p2)  }
   0xb   : > { %v931_v14 = vld [vmem:[%s1189_s1 + $0x18] sm:$0xff] (!%p138_p2)   ;;  %v935_v18 = vld [vmem:[%s1189_s1 + $0x20] sm:$0xff] (!%p138_p2)   ;;  %v939_v22 = vld [vmem:[%s1189_s1 + $0x28] sm:$0xff] (!%p138_p2)  }
   0xc   : > { %844 = vmatpush3.bf16.msra.mxu0 (!%p138_p2), %v923_v6  ;;  %v932_v15 = vld [vmem:[%s1189_s1 + $0x98] sm:$0xff] (!%p138_p2)   ;;  %v936_v19 = vld [vmem:[%s1189_s1 + $0xa0] sm:$0xff] (!%p138_p2)   ;;  %v940_v23 = vld [vmem:[%s1189_s1 + $0xa8] sm:$0xff] (!%p138_p2)  }
   0xd   : > { %866 = vmatpush3.bf16.msra.mxu1 %v924_v7  ;;  %845 = vmatprep.subr.bf16.mxu0 %v925_v8  ;;  %s1193_s13 = smov (!%p161_p3, %s778_s13), 1  ;;  %v941_v24 = vld [vmem:[%s1189_s1 + $0x70] sm:$0xff]   ;;  %v945_v28 = vld [vmem:[%s1189_s1 + $0x78] sm:$0xff]   ;;  %v955_v36 = vld [vmem:[%s1189_s1 + $0x140] sm:$0xff]  }
   0xe   : > { %867 = vmatprep.subr.bf16.mxu1 %v926_v9  ;;  %v942_v25 = vld [vmem:[%s1189_s1 + $0xf0] sm:$0xff]   ;;  %s907_s16 = smul.u32 48, %s1193_s13  ;;  %v946_v29 = vld [vmem:[%s1189_s1 + $0xf8] sm:$0xff]   ;;  %v956_v37 = vld [vmem:[%s1189_s1 + $0x100] sm:$0xff]  }
   0xf   : > { %v943_v26 = vld [vmem:[%s1189_s1 + $0x30] sm:$0xff]   ;;  %v947_v30 = vld [vmem:[%s1189_s1 + $0x38] sm:$0xff]   ;;  %v957_v38 = vld [vmem:[%s1189_s1 + $0x148] sm:$0xff]   ;;  %s908_s15 = smul.u32 24, %s1193_s13 }
  0x10   : > { %846 = vmatpush3.bf16.msra.mxu0 %v927_v10  ;;  %v944_v27 = vld [vmem:[%s1189_s1 + $0xb0] sm:$0xff]   ;;  %s1110_s27 = scalar_lea.vmem %s1188_s0, %s907_s16  ;;  %v948_v31 = vld [vmem:[%s1189_s1 + $0xb8] sm:$0xff]   ;;  %v958_v39 = vld [vmem:[%s1189_s1 + $0x108] sm:$0xff]  }
  0x11   : > { %868 = vmatpush3.bf16.msra.mxu1 %v928_v11  ;;  %847 = vmatprep.subr.bf16.mxu0 %v929_v12  ;;  %v949_v32 = vld [vmem:[%s1110_s27] ss:$24 sps:$4 sm:$0xff]   ;;  %v951_v33 = vld [vmem:[%s1110_s27 + $0x4] ss:$24 sps:$4 sm:$0xff]   ;;  %v959_v40 = vld [vmem:[%s1189_s1 + $0x150] sm:$0xff]   ;;  %s170_s18 = scalar_lea.vmem %s1191_s3, %s908_s15 }
  0x12   : > { %869 = vmatprep.subr.bf16.mxu1 %v930_v13  ;;  %v952_v34 = vld [vmem:[%s1110_s27 + $0x8] ss:$24 sps:$4 sm:$0xff]   ;;  %v954_v35 = vld [vmem:[%s1110_s27 + $0xc] ss:$24 sps:$4 sm:$0xff]   ;;  %624 = vmatprep.mubr.bf16.mxu0 %v951_v33  ;;  %v960_v41 = vld [vmem:[%s1189_s1 + $0x110] sm:$0xff]  }
  0x13   : > { %665 = vmatprep.mubr.bf16.mxu1 %v954_v35  ;;  %v961_v42 = vld [vmem:[%s1189_s1 + $0x158] sm:$0xff]   ;;  %v963_v44 = vld [vmem:[%s1189_s1 + $0x160] sm:$0xff]   ;;  %v965_v46 = vld [vmem:[%s1189_s1 + $0x168] sm:$0xff]  }
  0x14   : > { %848 = vmatpush3.bf16.msra.mxu0 %v931_v14  ;;  %v962_v43 = vld [vmem:[%s1189_s1 + $0x118] sm:$0xff]   ;;  %v964_v45 = vld [vmem:[%s1189_s1 + $0x120] sm:$0xff]   ;;  %v973_v47 = vld [vmem:[%s1110_s27 + $0x14] ss:$24 sps:$4 sm:$0xff]  }
  0x15   : > { %870 = vmatpush3.bf16.msra.mxu1 %v932_v15  ;;  %849 = vmatprep.subr.bf16.mxu0 %v933_v16  ;;  %v966_v48 = vld [vmem:[%s1189_s1 + $0x128] sm:$0xff]   ;;  %v967_v49 = vld [vmem:[%s1189_s1 + $0x170] sm:$0xff]   ;;  %v969_v51 = vld [vmem:[%s1189_s1 + $0x178] sm:$0xff]  }
  0x16   : > { %871 = vmatprep.subr.bf16.mxu1 %v934_v17  ;;  %v968_v50 = vld [vmem:[%s1189_s1 + $0x130] sm:$0xff]   ;;  %v970_v52 = vld [vmem:[%s1189_s1 + $0x138] sm:$0xff]   ;;  %v721_v54 = vld [vmem:[%s1190_s2] sm:$0x1] }
  0x17   : > { %v971_v53 = vld [vmem:[%s1110_s27 + $0x10] ss:$24 sps:$4 sm:$0xff]   ;;  %722 = vst [vmem:[%s170_s18] sm:$0x1] %v721_v54 }
  0x18   : > { %850 = vmatpush3.bf16.msra.mxu0 %v935_v18  ;;  %v715_v9 = vld [vmem:[%s1190_s2 + $0x1] sm:$0xff]  ;;  %v716_v13 = vld [vmem:[%s1190_s2 + $0x9] sm:$0xff] }
  0x19   : > { %872 = vmatpush3.bf16.msra.mxu1 %v936_v19  ;;  %851 = vmatprep.subr.bf16.mxu0 %v937_v20 }
  0x1a   : > { %873 = vmatprep.subr.bf16.mxu1 %v938_v21 }
  0x1c   : > { %852 = vmatpush3.bf16.msra.mxu0 %v939_v22 }
  0x1d   : > { %874 = vmatpush3.bf16.msra.mxu1 %v940_v23  ;;  %853 = vmatprep.subr.bf16.mxu0 %v941_v24 }
  0x1e   : > { %875 = vmatprep.subr.bf16.mxu1 %v942_v25 }
  0x20   : > { %854 = vmatpush3.bf16.msra.mxu0 %v943_v26 }
  0x21   : > { %876 = vmatpush3.bf16.msra.mxu1 %v944_v27  ;;  %855 = vmatprep.subr.bf16.mxu0 %v945_v28 }
  0x22   : > { %877 = vmatprep.subr.bf16.mxu1 %v946_v29 }
  0x24   : > { %856 = vmatpush3.bf16.msra.mxu0 %v947_v30 }
  0x25   : > { %878 = vmatpush3.bf16.msra.mxu1 %v948_v31  ;;  %885 = vmatprep.subr.bf16.mxu0 %v955_v36 }
  0x27   : > { %625 = vmatmul.mubr.bf16.vlgmr.msra.gmra.mrb[0].mxu0 %v949_v32 }
  0x28   : > { %666 = vmatmul.mubr.bf16.vlgmr.msra.gmra.mrb[0].mxu1 %v952_v34  ;;  %886 = vmatpush3.bf16.msra.mxu0 %v956_v37 }
  0x29   : > { %887 = vmatprep.subr.bf16.mxu0 %v957_v38  ;;  %706 = vmatprep.mubr.bf16.mxu0 %v973_v47 }
  0x2c   : > { %888 = vmatpush3.bf16.msra.mxu0 %v958_v39 }
  0x2d   : > { %889 = vmatprep.subr.bf16.mxu0 %v959_v40 }
  0x30   : > { %890 = vmatpush3.bf16.msra.mxu0 %v960_v41 }
  0x31   : > { %891 = vmatprep.subr.bf16.mxu0 %v961_v42 }
  0x34   : > { %892 = vmatpush3.bf16.msra.mxu0 %v962_v43 }
  0x35   : > { %893 = vmatprep.subr.bf16.mxu0 %v963_v44 }
  0x38   : > { %894 = vmatpush3.bf16.msra.mxu0 %v964_v45 }
  0x39   : > { %895 = vmatprep.subr.bf16.mxu0 %v965_v46 }
  0x3c   : > { %896 = vmatpush3.bf16.msra.mxu0 %v966_v48 }
  0x3d   : > { %897 = vmatprep.subr.bf16.mxu0 %v967_v49 }
  0x40   : > { %898 = vmatpush3.bf16.msra.mxu0 %v968_v50 }
  0x41   : > { %899 = vmatprep.subr.bf16.mxu0 %v969_v51 }
  0x44   : > { %900 = vmatpush3.bf16.msra.mxu0 %v970_v52 }
  0x47   : > { %707 = vmatmul.mubr.bf16.vlgmr.msra.gmra.mrb[4].mxu0 %v971_v53 }
  0xfa   : > { %v857_v55 = vpop.f32.mrb[0].mxu0 }
  0xfb   : > { %v879_v56 = vpop.f32.mrb[0].mxu1  ;;  %v858_v57 = vpop.f32.mrb[1].mxu0 }
  0xfc   : > { %v859_v58 = vadd.f32 %v858_v57, %v857_v55  ;;  %v880_v59 = vpop.f32.mrb[1].mxu1  ;;  %v860_v60 = vpop.f32.mrb[2].mxu0 }
  0xfd   : > { %v881_v61 = vadd.f32 %v880_v59, %v879_v56  ;;  %v882_v62 = vpop.f32.mrb[2].mxu1  ;;  %v861_v63 = vpop.f32.mrb[3].mxu0 }
  0xfe   : > { %v862_v0 = vadd.f32 %v861_v63, %v860_v60  ;;  %v883_v1 = vpop.f32.mrb[3].mxu1 }
  0xff   : > { %v668_v2 = vadd.f32 %v881_v61, %v859_v58  ;;  %v884_v3 = vadd.f32 %v883_v1, %v882_v62 }
 0x101   : > { %v671_v4 = vadd.f32 %v884_v3, %v862_v0 }
 0x11a   : > { %v901_v5 = vpop.f32.mrb[4].mxu0 }
 0x11b   : > { %v902_v6 = vpop.f32.mrb[5].mxu0 }
 0x11c   : > { %v903_v7 = vadd.f32 %v902_v6, %v901_v5  ;;  %v904_v8 = vpop.f32.mrb[6].mxu0 }
 0x11d   : > { %v905_v10 = vpop.f32.mrb[7].mxu0 }
 0x11e   : > { %v709_v11 = vadd.f32 %v903_v7, %v668_v2  ;;  %v906_v12 = vadd.f32 %v905_v10, %v904_v8 }
 0x120   : > { %v717_v14 = vadd.f32 %v715_v9, %v709_v11  ;;  %v712_v15 = vadd.f32 %v906_v12, %v671_v4 }
 0x122   : > { %719 = vst [vmem:[%s170_s18 + $0x1] sm:$0xff] %v717_v14  ;;  %v718_v16 = vadd.f32 %v716_v13, %v712_v15 }
 0x124   : > { %720 = vst [vmem:[%s170_s18 + $0x9] sm:$0xff] %v718_v16 }
 0x125 PF: > { %s13_s12 = sadd.s32 1, %s980_s12  }
 0x126   : > { %p10_p4 = scmp.ge.s32.totalorder %s13_s12, 4  }
 0x128   :  { %12 = sbr.rel (!%p10_p4) target bundleno = 1 (0x1), region = 62 }

</bundles_post_ra>
